<compile_context>
chip_gen: v5e
topology: v5e:2x2
jax: 0.10.0
libtpu: 0.0.40
codegen_flags: <defaults>
</compile_context>

<pallas_src>
import functools

import jax
import jax.numpy as jnp
from jax.experimental import pallas as pl
from jax.experimental.pallas import tpu as pltpu


def _primary_caps_kernel(w_ref, b_ref, patches_ref, poses_ref, act_ref, *,
                         num_capsules, out_channels):
    oc = out_channels

    # Conv1d as a single MXU matmul over the im2col'd tile:
    #   u[cap*oc + o, m]  with m = flattened (batch, out-position) lane index.
    u = jnp.dot(w_ref[...], patches_ref[...],
                preferred_element_type=jnp.float32)
    u = u + b_ref[...]                                   # (NC*OC, TM), f32

    # squash_v1 over the capsule axis (rows grouped as cap*oc + o):
    # squared norm per out-channel/lane, reduced over the NC sublane blocks.
    u2 = u * u
    s = u2[0:oc, :]
    for c in range(1, num_capsules):
        s = s + u2[c * oc:(c + 1) * oc, :]               # (OC, TM)

    denom = 0.5 + s
    scale = jnp.sqrt(s) / denom                          # (OC, TM)  (exact)

    # poses = scale * u: broadcast scale across the capsule blocks once and
    # do a single full-width lane-dense store (no narrow per-capsule stores).
    scale_full = jnp.concatenate([scale] * num_capsules, axis=0)  # (NC*OC, TM)
    poses_ref[...] = scale_full * u

    # activations = sqrt(sum_c poses_c^2) = scale * sqrt(s) = s / (0.5 + s)
    # (exact algebraic identity; removes the second capsule loop and a sqrt).
    act_ref[...] = s / denom


def primary_caps(x, weight, bias, *, num_capsules, out_channels,
                 kernel_size, stride, compute_dtype=jnp.float32,
                 tm_max=2048, vmem_budget_bytes=20 * 1024 * 1024):
    """x: (B, C_in, L) f32; weight: (NC*OC, C_in, K); bias: (NC*OC,).

    Returns (poses, activations) with PyTorch shapes
      poses: (B, NC, OC, L_out, 1), activations: (B, OC, L_out, 1).

    compute_dtype=jnp.bfloat16 halves the HBM read of patches/weights on
    v6e/v7x (accumulation and squash stay in f32); default keeps exact f32.
    """
    B, c_in, L = x.shape
    K = kernel_size
    L_out = (L - K) // stride + 1
    nc, oc = num_capsules, out_channels
    ncoc = nc * oc
    M = B * L_out
    CK = c_in * K

    # --- im2col glue (plain JAX), directly into the transposed slab ---
    # patches_T[c*K + k, b*L_out + l] = x[b, c, l*stride + k]
    # TODO(synk): for stride==1 this im2col could be fused into the kernel
    # (K shifted matmuls on an x tile) to cut the input HBM read ~K x; kept
    # in the wrapper so arbitrary stride / kernel_size / batch boundaries
    # stay supported, and because the poses writeback dominates HBM traffic
    # for typical PrimaryCaps shapes.
    cols = jnp.stack([x[:, :, k:k + stride * L_out:stride] for k in range(K)],
                     axis=2)                                   # (B, C_in, K, L_out)
    patches_t = cols.transpose(1, 2, 0, 3).reshape(CK, M)      # (C_in*K, M)
    w_t = weight.reshape(ncoc, CK)                             # (NC*OC, C_in*K)
    b_col = bias.reshape(ncoc, 1).astype(jnp.float32)          # (NC*OC, 1)

    if patches_t.dtype != compute_dtype:
        patches_t = patches_t.astype(compute_dtype)
        w_t = w_t.astype(compute_dtype)

    # --- pick the lane tile TM: multiple of 128, sized for the worst-case
    # VMEM budget (v7x: 64 MiB physical, 32 MiB scoped default) with
    # triple-buffered streamed input and double-buffered outputs ---
    in_bytes = jnp.dtype(compute_dtype).itemsize
    bytes_per_col = 3 * CK * in_bytes + 2 * (ncoc + oc) * 4
    tm = int(vmem_budget_bytes // bytes_per_col)
    tm = max(128, min(tm_max, (tm // 128) * 128))
    tm = min(tm, pl.cdiv(M, 128) * 128)       # don't tile wider than the data
    grid = pl.cdiv(M, tm)
    m_pad = grid * tm
    if m_pad != M:
        # Zero padding: padded lanes see u = bias, s >= 0 (no NaNs); they are
        # sliced off after the call.
        patches_t = jnp.pad(patches_t, ((0, 0), (0, m_pad - M)))

    kernel = functools.partial(_primary_caps_kernel,
                               num_capsules=nc, out_channels=oc)

    patches_spec = pl.BlockSpec((CK, tm), lambda i: (0, i))
    if grid > 1:
        # Deeper buffering on the dominant streamed input once the grid is real.
        patches_spec = pl.BlockSpec((CK, tm), lambda i: (0, i),
                                    pipeline_mode=pl.Buffered(3))

    cost = pl.CostEstimate(
        flops=2 * ncoc * CK * m_pad + 6 * ncoc * m_pad,
        transcendentals=oc * m_pad,
        bytes_accessed=(CK * m_pad + ncoc * CK + ncoc) * in_bytes
                       + (ncoc + oc) * m_pad * 4,
    )

    poses_t, acts_t = pl.pallas_call(
        kernel,
        out_shape=(
            jax.ShapeDtypeStruct((ncoc, m_pad), jnp.float32),
            jax.ShapeDtypeStruct((oc, m_pad), jnp.float32),
        ),
        grid=(grid,),
        in_specs=[
            pl.BlockSpec((ncoc, CK), lambda i: (0, 0)),   # weights: constant block
            pl.BlockSpec((ncoc, 1), lambda i: (0, 0)),    # bias: tiny constant block
            patches_spec,                                 # streamed, lane-tiled
        ],
        out_specs=(
            pl.BlockSpec((ncoc, tm), lambda i: (0, i)),
            pl.BlockSpec((oc, tm), lambda i: (0, i)),
        ),
        compiler_params=pltpu.CompilerParams(
            dimension_semantics=("parallel",)),
        cost_estimate=cost,
    )(w_t, b_col, patches_t)

    # --- glue back to PyTorch layout ---
    poses = (poses_t[:, :M].reshape(nc, oc, B, L_out)
             .transpose(2, 0, 1, 3)[..., None])                 # (B, NC, OC, L_out, 1)
    activations = (acts_t[:, :M].reshape(oc, B, L_out)
                   .transpose(1, 0, 2)[..., None])              # (B, OC, L_out, 1)
    return poses, activations


def _reference(x, weight, bias, *, num_capsules, out_channels, stride):
    """Pure-JAX reference mirroring the PyTorch forward."""
    B = x.shape[0]
    u = jax.lax.conv_general_dilated(
        x, weight, window_strides=(stride,), padding="VALID",
        dimension_numbers=("NCH", "OIH", "NCH")) + bias[None, :, None]
    u = u.reshape(B, num_capsules, out_channels, -1, 1)
    s = (u ** 2).sum(axis=1, keepdims=True)
    scale = jnp.sqrt(s) / (0.5 + s)
    poses = scale * u
    activations = jnp.sqrt((poses ** 2).sum(axis=1))
    return poses, activations


if __name__ == "__main__":
    # Module hyperparameters (small, consistent with PrimaryCaps __init__).
    num_capsules = 8
    in_channels = 4
    out_channels = 4
    kernel_size = 3
    stride = 1

    # Input: (batch, in_channels, length) -- Conv1d NCL layout.
    B, L = 2, 16

    key = jax.random.PRNGKey(0)
    kx, kw, kb = jax.random.split(key, 3)

    x = jax.random.normal(kx, (B, in_channels, L), dtype=jnp.float32)

    # Deterministic parameter init (xavier_uniform for weight, uniform bias).
    fan_in = in_channels * kernel_size
    fan_out = out_channels * num_capsules * kernel_size
    w_bound = (6.0 / (fan_in + fan_out)) ** 0.5
    weight = jax.random.uniform(
        kw, (out_channels * num_capsules, in_channels, kernel_size),
        minval=-w_bound, maxval=w_bound, dtype=jnp.float32)
    b_bound = 1.0 / (fan_in ** 0.5)
    bias = jax.random.uniform(
        kb, (out_channels * num_capsules,),
        minval=-b_bound, maxval=b_bound, dtype=jnp.float32)

    poses, activations = primary_caps(
        x, weight, bias,
        num_capsules=num_capsules, out_channels=out_channels,
        kernel_size=kernel_size, stride=stride)
    jax.block_until_ready((poses, activations))

    poses_ref, act_ref = _reference(
        x, weight, bias,
        num_capsules=num_capsules, out_channels=out_channels, stride=stride)

    assert poses.shape == poses_ref.shape and activations.shape == act_ref.shape
    assert jnp.allclose(poses, poses_ref, atol=1e-5, rtol=1e-5)
    assert jnp.allclose(activations, act_ref, atol=1e-5, rtol=1e-5)

    print("KERNEL_OK")
</pallas_src>

<mosaic_0001>
module attributes {stable_mosaic.version = 11 : i64} {
  func.func @_primary_caps_kernel(%arg0: i32, %arg1: memref<32x12xf32, #tpu.memory_space<vmem>>, %arg2: memref<32x1xf32, #tpu.memory_space<vmem>>, %arg3: memref<12x128xf32, #tpu.memory_space<vmem>>, %arg4: memref<32x128xf32, #tpu.memory_space<vmem>>, %arg5: memref<4x128xf32, #tpu.memory_space<vmem>>) attributes {dimension_semantics = [#tpu.dimension_semantics<parallel>], iteration_bounds = array<i64: 1>, scalar_prefetch = 0 : i64, scratch_operands = 0 : i64, tpu.core_type = #tpu.core_type<tc>, window_params = [{pipeline_mode = #tpu.pipeline_mode<synchronous>, transform_indices = @transform_0, window_bounds = array<i64: 32, 12>}, {pipeline_mode = #tpu.pipeline_mode<synchronous>, transform_indices = @transform_1, window_bounds = array<i64: 32, 1>}, {transform_indices = @transform_2, window_bounds = array<i64: 12, 128>}, {transform_indices = @transform_3, window_bounds = array<i64: 32, 128>}, {transform_indices = @transform_4, window_bounds = array<i64: 4, 128>}]} {
    %c0 = arith.constant 0 : index
    %c0_0 = arith.constant 0 : index
    %0 = vector.load %arg1[%c0, %c0_0] : memref<32x12xf32, #tpu.memory_space<vmem>>, vector<32x12xf32>
    %c0_1 = arith.constant 0 : index
    %c0_2 = arith.constant 0 : index
    %1 = vector.load %arg3[%c0_1, %c0_2] : memref<12x128xf32, #tpu.memory_space<vmem>>, vector<12x128xf32>
    %cst = arith.constant dense<0.000000e+00> : vector<32x128xf32>
    %2 = tpu.matmul %0, %1, %cst {dimension_numbers = #tpu.dot_dimension_numbers<[1], [0], [0], [1], [0, 0, 1, 1], [], []>} : vector<32x12xf32>, vector<12x128xf32>, vector<32x128xf32> -> vector<32x128xf32>
    %c0_3 = arith.constant 0 : index
    %c0_4 = arith.constant 0 : index
    %3 = vector.load %arg2[%c0_3, %c0_4] : memref<32x1xf32, #tpu.memory_space<vmem>>, vector<32x1xf32>
    %4 = vector.broadcast %3 : vector<32x1xf32> to vector<32x128xf32>
    %5 = arith.addf %2, %4 : vector<32x128xf32>
    %6 = arith.mulf %5, %5 : vector<32x128xf32>
    %7 = vector.extract_strided_slice %6 {offsets = [0, 0], sizes = [4, 128], strides = [1, 1]} : vector<32x128xf32> to vector<4x128xf32>
    %8 = vector.extract_strided_slice %6 {offsets = [4, 0], sizes = [4, 128], strides = [1, 1]} : vector<32x128xf32> to vector<4x128xf32>
    %9 = arith.addf %7, %8 : vector<4x128xf32>
    %10 = vector.extract_strided_slice %6 {offsets = [8, 0], sizes = [4, 128], strides = [1, 1]} : vector<32x128xf32> to vector<4x128xf32>
    %11 = arith.addf %9, %10 : vector<4x128xf32>
    %12 = vector.extract_strided_slice %6 {offsets = [12, 0], sizes = [4, 128], strides = [1, 1]} : vector<32x128xf32> to vector<4x128xf32>
    %13 = arith.addf %11, %12 : vector<4x128xf32>
    %14 = vector.extract_strided_slice %6 {offsets = [16, 0], sizes = [4, 128], strides = [1, 1]} : vector<32x128xf32> to vector<4x128xf32>
    %15 = arith.addf %13, %14 : vector<4x128xf32>
    %16 = vector.extract_strided_slice %6 {offsets = [20, 0], sizes = [4, 128], strides = [1, 1]} : vector<32x128xf32> to vector<4x128xf32>
    %17 = arith.addf %15, %16 : vector<4x128xf32>
    %18 = vector.extract_strided_slice %6 {offsets = [24, 0], sizes = [4, 128], strides = [1, 1]} : vector<32x128xf32> to vector<4x128xf32>
    %19 = arith.addf %17, %18 : vector<4x128xf32>
    %20 = vector.extract_strided_slice %6 {offsets = [28, 0], sizes = [4, 128], strides = [1, 1]} : vector<32x128xf32> to vector<4x128xf32>
    %21 = arith.addf %19, %20 : vector<4x128xf32>
    %cst_5 = arith.constant 5.000000e-01 : f32
    %22 = vector.broadcast %cst_5 : f32 to vector<4x128xf32>
    %23 = arith.addf %22, %21 : vector<4x128xf32>
    %24 = math.sqrt %21 : vector<4x128xf32>
    %25 = arith.divf %24, %23 : vector<4x128xf32>
    %26 = tpu.concatenate %25, %25, %25, %25, %25, %25, %25, %25 in 0 : vector<4x128xf32>, vector<4x128xf32>, vector<4x128xf32>, vector<4x128xf32>, vector<4x128xf32>, vector<4x128xf32>, vector<4x128xf32>, vector<4x128xf32> -> vector<32x128xf32>
    %27 = arith.mulf %26, %5 : vector<32x128xf32>
    %c0_6 = arith.constant 0 : index
    %c0_7 = arith.constant 0 : index
    %28 = vector.load %arg4[%c0_6, %c0_7] : memref<32x128xf32, #tpu.memory_space<vmem>>, vector<32x128xf32>
    tpu.vector_store %arg4[%c0_6, %c0_7], %27 {strides = array<i32>} : memref<32x128xf32, #tpu.memory_space<vmem>>, vector<32x128xf32>,
    %29 = arith.divf %21, %23 : vector<4x128xf32>
    %c0_8 = arith.constant 0 : index
    %c0_9 = arith.constant 0 : index
    %30 = vector.load %arg5[%c0_8, %c0_9] : memref<4x128xf32, #tpu.memory_space<vmem>>, vector<4x128xf32>
    tpu.vector_store %arg5[%c0_8, %c0_9], %29 {strides = array<i32>} : memref<4x128xf32, #tpu.memory_space<vmem>>, vector<4x128xf32>,
    return
  }
  func.func @transform_0(%arg0: i32) -> (i32, i32) {
    %c0_i32 = arith.constant 0 : i32
    %c0_i32_0 = arith.constant 0 : i32
    %c0_i32_1 = arith.constant 0 : i32
    return %c0_i32, %c0_i32_0 : i32, i32
  }
  func.func @transform_1(%arg0: i32) -> (i32, i32) {
    %c0_i32 = arith.constant 0 : i32
    %c0_i32_0 = arith.constant 0 : i32
    %c0_i32_1 = arith.constant 0 : i32
    return %c0_i32, %c0_i32_0 : i32, i32
  }
  func.func @transform_2(%arg0: i32) -> (i32, i32) {
    %c0_i32 = arith.constant 0 : i32
    %c0_i32_0 = arith.constant 0 : i32
    return %c0_i32, %arg0 : i32, i32
  }
  func.func @transform_3(%arg0: i32) -> (i32, i32) {
    %c0_i32 = arith.constant 0 : i32
    %c0_i32_0 = arith.constant 0 : i32
    return %c0_i32, %arg0 : i32, i32
  }
  func.func @transform_4(%arg0: i32) -> (i32, i32) {
    %c0_i32 = arith.constant 0 : i32
    %c0_i32_0 = arith.constant 0 : i32
    return %c0_i32, %arg0 : i32, i32
  }
}

</mosaic_0001>

<bundles_post_ra>
// kernel: tpu_custom_call.1
= control target key start
LH: loop header
LB: loop body
LE: loop exit
PB: predicated region body
PF: predicated region fallthrough
CT: control target
= control target key end

     0   :  { %10 = vsyncpa [#allocation3], 0  ;;  %vm61_vm0 = vcmask 1043456   ;;  %v267_v3 = vmov 0   ;;  %vm48_vm1 = vcmask 97280   ;;  %s348_s0 = inlined_call_operand.vmem [shape: f32[32,12], index: 0, kind: input, shape index: {}]   ;;  %s349_s1 = inlined_call_operand.vmem [shape: f32[32,1], index: 1, kind: input, shape index: {}]   ;;  %s350_s2 = inlined_call_operand.vmem [shape: f32[12,128], index: 2, kind: input, shape index: {}]   ;;  %s351_s3 = inlined_call_operand.hbm [shape: f32[32,128], index: 3, kind: output, shape index: {0}]   ;;  %s352_s4 = inlined_call_operand.hbm [shape: f32[4,128], index: 4, kind: output, shape index: {1}]  }
   0x1   :  { %v23_v0 = vld [vmem:[%s350_s2 + $0x8] sm:$0xf]  ;;  %v22_v1 = vld [vmem:[%s350_s2] sm:$0xff]  ;;  %209 = vset.pattern.permute.xlu0 %v267_v3 }
   0x2   :  { %193 = vmatpush.msk.msra.mxu0 %vm61_vm0, %v23_v0  ;;  %198 = vmatpush.msk.msra.mxu1 %vm61_vm0, %v23_v0  ;;  %v24_v2 = vld [vmem:[%s349_s1] sm:$0xff]  ;;  %v19_v5 = vld [vmem:[%s348_s0 + $0x8] sm:$0xff] }
   0x3   :  { %199 = vmatpush.msk.msra.mxu2 %vm61_vm0, %v23_v0  ;;  %200 = vmatpush.msk.msra.mxu3 %vm61_vm0, %v23_v0  ;;  %v18_v4 = vld [vmem:[%s348_s0] sm:$0xff] }
   0x4   :  { %80 = vmatpush.msra.mxu0 %v22_v1 }
   0x5   :  { %11 = vsyncpa [#allocation5], 0  ;;  %30 = vperm.xlu0 %209, %v24_v2   ;;  %201 = vmatpush.msra.mxu1 %v22_v1  ;;  %v20_v6 = vld [vmem:[%s348_s0 + $0x10] sm:$0xff]  ;;  %v21_v7 = vld [vmem:[%s348_s0 + $0x18] sm:$0xff]  ;;  %s268_s0 = smov [#allocation4]   ;;  %s179_s10 = sshll.u32 %s352_s4, 4  ;;  %s180_s10 = int_to_ptr.hbm [resolvable:$true] %s179_s10 }
   0x6   :  { %202 = vmatpush.msra.mxu2 %v22_v1  ;;  %203 = vmatpush.msra.mxu3 %v22_v1  ;;  %v26_v8 = vld [vmem:[%s349_s1 + $0x10] sm:$0xff]  ;;  %v25_v9 = vld [vmem:[%s349_s1 + $0x8] sm:$0xff]  ;;  %v27_v10 = vld [vmem:[%s349_s1 + $0x18] sm:$0xff]  ;;  %s177_s1 = sshll.u32 %s268_s0, 4  ;;  %s269_s11 = smov [#allocation2]   ;;  %s178_s1 = int_to_ptr.vmem [resolvable:$true] %s177_s1 }
   0x7   :  { %194 = vmatmul.msk.f32.vlgmr.msra.gmra.mxu0 %vm48_vm1, %v18_v4  ;;  %195 = vmatmul.msk.f32.vlgmr.msra.gmra.mxu1 %vm48_vm1, %v19_v5  ;;  %s163_s4 = sshll.u32 %s269_s11, 4  ;;  %s165_s14 = sshll.u32 %s351_s3, 4  ;;  %s164_s4 = int_to_ptr.vmem [resolvable:$true] %s163_s4  ;;  %s166_s14 = int_to_ptr.hbm [resolvable:$true] %s165_s14 }
   0x8   :  { %196 = vmatmul.msk.f32.vlgmr.msra.gmra.mxu2 %vm48_vm1, %v20_v6  ;;  %197 = vmatmul.msk.f32.vlgmr.msra.gmra.mxu3 %vm48_vm1, %v21_v7  ;;  %s270_s15 = smov 128   ;;  %s271_s16 = smov 8  }
   0x9   :  { %210 = vset.pattern.permute.xlu1 %v267_v3 }
   0xa   :  { %40 = vperm.xlu1 %210, %v26_v8  }
   0xd   :  { %35 = vperm.xlu0 %209, %v25_v9  }
  0x12   :  { %45 = vperm.xlu1 %210, %v27_v10  }
  0x77   :  { %v31_v11 = vpop.permute.xlu0 %30 }
  0x7c   :  { %v41_v12 = vpop.permute.xlu1 %40 }
  0x7f   :  { %v36_v13 = vpop.permute.xlu0 %35 }
  0x84   :  { %v82_v14 = vpop.f32.mrf.mxu0  ;;  %v85_v15 = vpop.f32.mrf.mxu1 }
  0x85   :  { %v331_v16 = vadd.f32 %v82_v14, %v31_v11  ;;  %v333_v17 = vadd.f32 %v85_v15, %v36_v13  ;;  %v46_v24 = vpop.permute.xlu1 %45 }
  0x87   :  { %v94_v18 = vmul.f32 %v331_v16, %v331_v16  ;;  %v95_v20 = vmul.f32 %v333_v17, %v333_v17 }
  0x89   :  { %v99_v19 = vrot.slane %v94_v18, 4  ;;  %v104_v27 = vrot.slane %v95_v20, 4 }
  0x8b   :  { %v101_v21 = vadd.f32 %v99_v19, %v94_v18  ;;  %v88_v22 = vpop.f32.mrf.mxu2  ;;  %v91_v23 = vpop.f32.mrf.mxu3 }
  0x8c   :  { %v89_v25 = vadd.f32 %v88_v22, %v41_v12  ;;  %v92_v28 = vadd.f32 %v91_v23, %v46_v24 }
  0x8d   :  { %v102_v26 = vadd.f32 %v101_v21, %v95_v20 }
  0x8e   :  { %v96_v29 = vmul.f32 %v89_v25, %v89_v25  ;;  %v97_v33 = vmul.f32 %v92_v28, %v92_v28 }
  0x8f   :  { %v106_v30 = vadd.f32 %v104_v27, %v102_v26 }
  0x90   :  { %v109_v32 = vrot.slane %v96_v29, 4  ;;  %v114_v36 = vrot.slane %v97_v33, 4 }
  0x91   :  { %v107_v31 = vadd.f32 %v106_v30, %v96_v29 }
  0x93   :  { %v111_v34 = vadd.f32 %v109_v32, %v107_v31 }
  0x95   :  { %v112_v35 = vadd.f32 %v111_v34, %v97_v33 }
  0x97   :  { %v116_v37 = vadd.f32 %v114_v36, %v112_v35 }
  0x99   :  { %v117_v38 = vadd.f32 0.5, %v116_v37  ;;  %211 = vrsqrt.f32 %v116_v37  ;;  %vm125_vm6 = vcmp.eq.f32.partialorder %v116_v37, inf  ;;  %v128_v55 = vand.u32 2147483648, %v116_v37 }
  0x9a   :  { %vm127_vm7 = vcmp.eq.f32.partialorder %v116_v37, 0.0 }
  0x9b   :  { %213 = vrcp.f32 %v117_v38  ;;  %v141_v46 = vand.u32 2147483648, %v117_v38  ;;  %v139_v49 = vand.u32 2147483647, %v117_v38  ;;  %vm135_vm3 = vweird.f32 %v117_v38 }
  0x9d   :  { %v142_v52 = vor.u32 1.1754944e-38, %v141_v46  ;;  %vm140_vm5 = vcmp.eq.f32.partialorder %v139_v49, 8.507059e+37 }
  0x9f   :  { %v212_v39 = vpop.eup %211 }
  0xa0   :  { %v119_v40 = vmul.f32 %v212_v39, %v116_v37 }
  0xa1   :  { %v214_v41 = vpop.eup %213 }
  0xa2   :  { %v120_v42 = vmul.f32 %v212_v39, %v119_v40  ;;  %v131_v43 = vmul.f32 %v214_v41, %v117_v38  ;;  %vm136_vm2 = vweird.f32 %v214_v41 }
  0xa3   :  { %vm137_vm4 = vmor %vm135_vm3, %vm136_vm2 }
  0xa4   :  { %v121_v44 = vmul.f32 0.5, %v120_v42  ;;  %v132_v45 = vsub.f32 1.0, %v131_v43 }
  0xa6   :  { %v122_v47 = vsub.f32 1.5, %v121_v44  ;;  %v133_v48 = vmul.f32 %v214_v41, %v132_v45 }
  0xa8   :  { %v123_v50 = vmul.f32 %v212_v39, %v122_v47  ;;  %v134_v51 = vadd.f32 %v214_v41, %v133_v48 }
  0xaa   :  { %v124_v53 = vmul.f32 %v123_v50, %v116_v37  ;;  %v138_v54 = vsel %vm137_vm4, %v214_v41, %v134_v51 }
  0xab   :  { %v143_v56 = vsel %vm140_vm5, %v142_v52, %v138_v54 }
  0xac   :  { %v126_v57 = vsel %vm125_vm6, %v116_v37, %v124_v53  ;;  %v157_v58 = vmul.f32 %v143_v56, %v116_v37 }
  0xad   :  { %v129_v59 = vsel %vm127_vm7, %v128_v55, %v126_v57 }
  0xae   :  { %v144_v60 = vmul.f32 %v143_v56, %v129_v59  ;;  %158 = vst [vmem:[#allocation4] sm:$0xf] %v157_v58 }
  0xaf   :  { %182 = dma.vmem_to_hbm [thread:$0]  %s178_s1, 64, %s180_s10, [#allocation5]  }
  0xb0   :  { %v146_v61 = vrot.slane %v144_v60, 4 }
  0xb2   :  { %v148_v62 = vsel %vm61_vm0, %v144_v60, %v146_v61 }
  0xb3   :  { %v149_v63 = vmul.f32 %v148_v62, %v331_v16  ;;  %v150_v0 = vmul.f32 %v148_v62, %v333_v17  ;;  %v151_v1 = vmul.f32 %v148_v62, %v89_v25  ;;  %v152_v2 = vmul.f32 %v148_v62, %v92_v28 }
  0xb5   :  { %153 = vst [vmem:[#allocation2] sm:$0xff] %v149_v63 }
  0xb6   :  { %154 = vst [vmem:[#allocation2 + $0x8] sm:$0xff] %v150_v0 }
  0xb7   :  { %155 = vst [vmem:[#allocation2 + $0x10] sm:$0xff] %v151_v1 }
  0xb8   :  { %156 = vst [vmem:[#allocation2 + $0x18] sm:$0xff] %v152_v2 }
  0xb9   :  { %171 = dma.vmem_to_hbm [thread:$0]  %s164_s4, 512, %s166_s14, [#allocation3], %s270_s15, %s270_s15, %s271_s16  }
  0xba   :  { %263 = dma.done.wait [#allocation3], 512  }
  0xbb   :  { %264 = vsyncadd [#allocation3], 4294966784 }
  0xbc   :  { %265 = dma.done.wait [#allocation5], 64  }
  0xbd   :  { %266 = vsyncadd [#allocation5], 4294967232 }
  0xbe   :  { %191 = vsyncpa [#allocation3], 1 }
  0xbf   :  { %192 = vsyncpa [#allocation5], 1 }

</bundles_post_ra>
